<compile_context>
chip_gen: v7x
topology: tpu7x:2x2x1
jax: 0.10.0
libtpu: 0.0.40
codegen_flags: <defaults>
</compile_context>

<pallas_src>
import functools

import jax
import jax.numpy as jnp
from jax.experimental import pallas as pl
from jax.experimental.pallas import tpu as pltpu

HID_PAD = 128   # hidden features padded to one full 128-lane row (H=32 -> 128)
OUT_PAD = 128   # class features padded to one full 128-lane row (T=16 -> 128)
SUBLANES = 8    # f32 sublanes per vreg -> pad batch to a multiple of 8


def _round_up(n, m):
    return ((n + m - 1) // m) * m


def rnn_seq_kernel(x_ref, h0_ref, wx_ref, wh_ref, b_ref,
                   out_ref, hid_ref, h_scr, *, num_classes):
    t = pl.program_id(0)

    # initialize the persistent hidden-state scratch at the first step
    @pl.when(t == 0)
    def _():
        h_scr[...] = h0_ref[...]

    x = x_ref[0]                 # (B_pad, T)
    h = h_scr[...]               # (B_pad, HID_PAD)

    # ONE fused projection: lanes [0, HID_PAD) -> new hidden,
    #                       lanes [HID_PAD, HID_PAD+OUT_PAD) -> logits.
    res = (jnp.dot(x, wx_ref[...], preferred_element_type=jnp.float32)
           + jnp.dot(h, wh_ref[...], preferred_element_type=jnp.float32)
           + b_ref[...])         # (B_pad, HID_PAD + OUT_PAD) f32

    hid_new = res[:, :HID_PAD]   # lane-aligned split (no lane shifts)
    logits = res[:, HID_PAD:]

    # masked, numerically stable LogSoftmax over the real class lanes only
    lane = jax.lax.broadcasted_iota(jnp.int32, logits.shape, 1)
    logits = jnp.where(lane < num_classes, logits, -jnp.inf)
    m = jnp.max(logits, axis=1, keepdims=True)
    shifted = logits - m
    lse = jnp.log(jnp.sum(jnp.exp(shifted), axis=1, keepdims=True))

    out_ref[0] = (shifted - lse).astype(out_ref.dtype)   # lane-dense 128-wide store
    h_scr[...] = hid_new                                 # carry recurrence in VMEM
    hid_ref[...] = hid_new.astype(hid_ref.dtype)         # resident block, HBM writeback once


def prepare_params(params):
    """One-time packing: fuse i2h/i2o into a single lane-padded weight & bias."""
    w_ih, b_ih = params["w_ih"], params["b_ih"]   # (H, C), (H,)
    w_io, b_io = params["w_io"], params["b_io"]   # (T, C), (T,)
    H, C = w_ih.shape
    T = w_io.shape[0]

    w_full = jnp.zeros((C, HID_PAD + OUT_PAD), jnp.float32)
    w_full = w_full.at[:, :H].set(w_ih.T)
    w_full = w_full.at[:, HID_PAD:HID_PAD + T].set(w_io.T)

    bias = jnp.zeros((1, HID_PAD + OUT_PAD), jnp.float32)
    bias = bias.at[0, :H].set(b_ih)
    bias = bias.at[0, HID_PAD:HID_PAD + T].set(b_io)

    w_x = w_full[:T]                                          # (T, 256): input rows
    w_h = jnp.zeros((HID_PAD, HID_PAD + OUT_PAD), jnp.float32)
    w_h = w_h.at[:H].set(w_full[T:])                          # (128, 256): hidden rows

    return {"w_x": w_x, "w_h": w_h, "bias": bias,
            "tensor_size": int(T), "hidden_size": int(H)}


def forger_rnn_sequence(xs, hidden0, prepped):
    """Run the RNN cell over a whole sequence in one fused Pallas kernel.

    xs:      (S, B, T) f32,  hidden0: (B, H) f32
    returns  (log_softmax outputs (S, B, T), final hidden (B, H))
    """
    S, B, T = xs.shape
    H = prepped["hidden_size"]
    assert T == prepped["tensor_size"]

    B_pad = _round_up(max(B, SUBLANES), SUBLANES)

    xs_p = jnp.zeros((S, B_pad, T), jnp.float32).at[:, :B, :].set(xs)
    h0_p = jnp.zeros((B_pad, HID_PAD), jnp.float32).at[:B, :H].set(hidden0)

    kernel = functools.partial(rnn_seq_kernel, num_classes=T)

    out_p, hid_p = pl.pallas_call(
        kernel,
        grid=(S,),
        in_specs=[
            pl.BlockSpec((1, B_pad, T), lambda t: (t, 0, 0)),              # per-step input
            pl.BlockSpec((B_pad, HID_PAD), lambda t: (0, 0)),              # h0 (resident)
            pl.BlockSpec((T, HID_PAD + OUT_PAD), lambda t: (0, 0)),        # W_x (resident)
            pl.BlockSpec((HID_PAD, HID_PAD + OUT_PAD), lambda t: (0, 0)),  # W_h (resident)
            pl.BlockSpec((1, HID_PAD + OUT_PAD), lambda t: (0, 0)),        # bias (resident)
        ],
        out_specs=[
            pl.BlockSpec((1, B_pad, OUT_PAD), lambda t: (t, 0, 0)),        # per-step log-softmax
            pl.BlockSpec((B_pad, HID_PAD), lambda t: (0, 0)),              # final hidden
        ],
        out_shape=(
            jax.ShapeDtypeStruct((S, B_pad, OUT_PAD), jnp.float32),
            jax.ShapeDtypeStruct((B_pad, HID_PAD), jnp.float32),
        ),
        scratch_shapes=[pltpu.VMEM((B_pad, HID_PAD), jnp.float32)],
        compiler_params=pltpu.CompilerParams(
            dimension_semantics=("arbitrary",)),   # time axis carries the recurrence
    )(xs_p, h0_p, prepped["w_x"], prepped["w_h"], prepped["bias"])

    return out_p[:, :B, :T], hid_p[:B, :H]


def forger_rnn_forward(x, hidden, prepped):
    """Single RNN cell step — matches forger_RNN.forward(input, hidden)."""
    outs, hid = forger_rnn_sequence(x[None], hidden, prepped)
    return outs[0], hid


def init_params(key, tensor_size, hidden_size):
    """Deterministic init matching PyTorch Linear shapes / uniform scheme."""
    c = tensor_size + hidden_size
    k_ih_w, k_ih_b, k_io_w, k_io_b = jax.random.split(key, 4)
    bound = 1.0 / jnp.sqrt(float(c))
    return {
        "w_ih": jax.random.uniform(k_ih_w, (hidden_size, c), jnp.float32,
                                   -bound, bound),
        "b_ih": jax.random.uniform(k_ih_b, (hidden_size,), jnp.float32,
                                   -bound, bound),
        "w_io": jax.random.uniform(k_io_w, (tensor_size, c), jnp.float32,
                                   -bound, bound),
        "b_io": jax.random.uniform(k_io_b, (tensor_size,), jnp.float32,
                                   -bound, bound),
    }


if __name__ == "__main__":
    tensor_size = 16
    hidden_size = 32
    batch = 2
    seq_len = 8

    key = jax.random.PRNGKey(0)
    k_params, k_x = jax.random.split(key)

    params = init_params(k_params, tensor_size, hidden_size)
    prepped = prepare_params(params)            # one-time weight packing

    xs = jax.random.normal(k_x, (seq_len, batch, tensor_size), jnp.float32)
    hidden0 = jnp.zeros((batch, hidden_size), jnp.float32)   # initHidden()

    # fused sequence (one pallas_call for all timesteps)
    outs, hid_final = forger_rnn_sequence(xs, hidden0, prepped)
    jax.block_until_ready((outs, hid_final))

    # single-step forward (matches the PyTorch module's forward signature)
    out1, hid1 = forger_rnn_forward(xs[0], hidden0, prepped)
    jax.block_until_ready((out1, hid1))

    # plain-JAX reference: the PyTorch forward, applied step by step
    def ref_step(x, h):
        comb = jnp.concatenate([x, h], axis=1)
        new_h = comb @ params["w_ih"].T + params["b_ih"]
        logits = comb @ params["w_io"].T + params["b_io"]
        return jax.nn.log_softmax(logits, axis=1), new_h

    h_ref = hidden0
    ref_outs = []
    for t in range(seq_len):
        o_ref, h_ref = ref_step(xs[t], h_ref)
        ref_outs.append(o_ref)
    ref_outs = jnp.stack(ref_outs)

    assert jnp.allclose(outs, ref_outs, atol=1e-3), "sequence output mismatch"
    assert jnp.allclose(hid_final, h_ref, atol=1e-3), "final hidden mismatch"

    o0_ref, h0_ref = ref_step(xs[0], hidden0)
    assert jnp.allclose(out1, o0_ref, atol=1e-3), "single-step output mismatch"
    assert jnp.allclose(hid1, h0_ref, atol=1e-3), "single-step hidden mismatch"

    print("KERNEL_OK")
</pallas_src>

<mosaic_0001>
module attributes {stable_mosaic.version = 11 : i64} {
  func.func @rnn_seq_kernel(%arg0: i32, %arg1: memref<1x8x16xf32, #tpu.memory_space<vmem>>, %arg2: memref<8x128xf32, #tpu.memory_space<vmem>>, %arg3: memref<16x256xf32, #tpu.memory_space<vmem>>, %arg4: memref<128x256xf32, #tpu.memory_space<vmem>>, %arg5: memref<1x256xf32, #tpu.memory_space<vmem>>, %arg6: memref<1x8x128xf32, #tpu.memory_space<vmem>>, %arg7: memref<8x128xf32, #tpu.memory_space<vmem>>, %arg8: memref<8x128xf32, #tpu.memory_space<vmem>>) attributes {dimension_semantics = [#tpu.dimension_semantics<arbitrary>], iteration_bounds = array<i64: 8>, scalar_prefetch = 0 : i64, scratch_operands = 1 : i64, tpu.core_type = #tpu.core_type<tc>, window_params = [{transform_indices = @transform_0, window_bounds = array<i64: 1, 8, 16>}, {pipeline_mode = #tpu.pipeline_mode<synchronous>, transform_indices = @transform_1, window_bounds = array<i64: 8, 128>}, {pipeline_mode = #tpu.pipeline_mode<synchronous>, transform_indices = @transform_2, window_bounds = array<i64: 16, 256>}, {pipeline_mode = #tpu.pipeline_mode<synchronous>, transform_indices = @transform_3, window_bounds = array<i64: 128, 256>}, {pipeline_mode = #tpu.pipeline_mode<synchronous>, transform_indices = @transform_4, window_bounds = array<i64: 1, 256>}, {transform_indices = @transform_5, window_bounds = array<i64: 1, 8, 128>}, {pipeline_mode = #tpu.pipeline_mode<synchronous>, transform_indices = @transform_6, window_bounds = array<i64: 8, 128>}]} {
    %c0_i32 = arith.constant 0 : i32
    %0 = arith.cmpi eq, %arg0, %c0_i32 : i32
    %1 = arith.extui %0 : i1 to i32
    %c0_i32_0 = arith.constant 0 : i32
    %2 = arith.cmpi ne, %1, %c0_i32_0 : i32
    scf.if %2 {
      %c0_22 = arith.constant 0 : index
      %c0_23 = arith.constant 0 : index
      %36 = vector.load %arg2[%c0_22, %c0_23] : memref<8x128xf32, #tpu.memory_space<vmem>>, vector<8x128xf32>
      %c0_24 = arith.constant 0 : index
      %c0_25 = arith.constant 0 : index
      %37 = vector.load %arg8[%c0_24, %c0_25] : memref<8x128xf32, #tpu.memory_space<vmem>>, vector<8x128xf32>
      tpu.vector_store %arg8[%c0_24, %c0_25], %36 {strides = array<i32>} : memref<8x128xf32, #tpu.memory_space<vmem>>, vector<8x128xf32>,
    } else {
    }
    %c0 = arith.constant 0 : index
    %c0_1 = arith.constant 0 : index
    %c0_2 = arith.constant 0 : index
    %3 = vector.load %arg1[%c0, %c0_1, %c0_2] : memref<1x8x16xf32, #tpu.memory_space<vmem>>, vector<1x8x16xf32>
    %4 = vector.shape_cast %3 : vector<1x8x16xf32> to vector<8x16xf32>
    %c0_3 = arith.constant 0 : index
    %c0_4 = arith.constant 0 : index
    %5 = vector.load %arg8[%c0_3, %c0_4] : memref<8x128xf32, #tpu.memory_space<vmem>>, vector<8x128xf32>
    %c0_5 = arith.constant 0 : index
    %c0_6 = arith.constant 0 : index
    %6 = vector.load %arg3[%c0_5, %c0_6] : memref<16x256xf32, #tpu.memory_space<vmem>>, vector<16x256xf32>
    %cst = arith.constant dense<0.000000e+00> : vector<8x256xf32>
    %7 = tpu.matmul %4, %6, %cst {dimension_numbers = #tpu.dot_dimension_numbers<[1], [0], [0], [1], [0, 0, 1, 1], [], []>} : vector<8x16xf32>, vector<16x256xf32>, vector<8x256xf32> -> vector<8x256xf32>
    %c0_7 = arith.constant 0 : index
    %c0_8 = arith.constant 0 : index
    %8 = vector.load %arg4[%c0_7, %c0_8] : memref<128x256xf32, #tpu.memory_space<vmem>>, vector<128x256xf32>
    %cst_9 = arith.constant dense<0.000000e+00> : vector<8x256xf32>
    %9 = tpu.matmul %5, %8, %cst_9 {dimension_numbers = #tpu.dot_dimension_numbers<[1], [0], [0], [1], [0, 0, 1, 1], [], []>} : vector<8x128xf32>, vector<128x256xf32>, vector<8x256xf32> -> vector<8x256xf32>
    %10 = arith.addf %7, %9 : vector<8x256xf32>
    %c0_10 = arith.constant 0 : index
    %c0_11 = arith.constant 0 : index
    %11 = vector.load %arg5[%c0_10, %c0_11] : memref<1x256xf32, #tpu.memory_space<vmem>>, vector<1x256xf32>
    %12 = vector.broadcast %11 : vector<1x256xf32> to vector<8x256xf32>
    %13 = arith.addf %10, %12 : vector<8x256xf32>
    %14 = vector.extract_strided_slice %13 {offsets = [0, 0], sizes = [8, 128], strides = [1, 1]} : vector<8x256xf32> to vector<8x128xf32>
    %15 = vector.extract_strided_slice %13 {offsets = [0, 128], sizes = [8, 128], strides = [1, 1]} : vector<8x256xf32> to vector<8x128xf32>
    %16 = tpu.iota {dimensions = array<i32: 1>} : vector<8x128xi32>
    %c16_i32 = arith.constant 16 : i32
    %17 = vector.broadcast %c16_i32 : i32 to vector<8x128xi32>
    %18 = arith.cmpi slt, %16, %17 : vector<8x128xi32>
    %cst_12 = arith.constant 0xFF800000 : f32
    %19 = vector.broadcast %cst_12 : f32 to vector<8x128xf32>
    %20 = arith.select %18, %15, %19 : vector<8x128xi1>, vector<8x128xf32>
    %cst_13 = arith.constant dense<0xFF800000> : vector<8xf32>
    %21 = vector.multi_reduction <maximumf>, %20, %cst_13 [1] : vector<8x128xf32> to vector<8xf32>
    %22 = vector.shape_cast %21 : vector<8xf32> to vector<8x1xf32>
    %23 = vector.broadcast %22 : vector<8x1xf32> to vector<8x128xf32>
    %24 = arith.subf %20, %23 : vector<8x128xf32>
    %25 = math.exp %24 : vector<8x128xf32>
    %cst_14 = arith.constant dense<0.000000e+00> : vector<8xf32>
    %26 = vector.multi_reduction <add>, %25, %cst_14 [1] : vector<8x128xf32> to vector<8xf32>
    %27 = vector.shape_cast %26 : vector<8xf32> to vector<8x1xf32>
    %28 = math.log %27 : vector<8x1xf32>
    %29 = vector.broadcast %28 : vector<8x1xf32> to vector<8x128xf32>
    %30 = arith.subf %24, %29 : vector<8x128xf32>
    %c0_15 = arith.constant 0 : index
    %c0_16 = arith.constant 0 : index
    %c0_17 = arith.constant 0 : index
    %31 = vector.load %arg6[%c0_15, %c0_16, %c0_17] : memref<1x8x128xf32, #tpu.memory_space<vmem>>, vector<1x8x128xf32>
    %32 = vector.shape_cast %31 : vector<1x8x128xf32> to vector<8x128xf32>
    %33 = vector.shape_cast %30 : vector<8x128xf32> to vector<1x8x128xf32>
    tpu.vector_store %arg6[%c0_15, %c0_16, %c0_17], %33 {strides = array<i32>} : memref<1x8x128xf32, #tpu.memory_space<vmem>>, vector<1x8x128xf32>,
    %c0_18 = arith.constant 0 : index
    %c0_19 = arith.constant 0 : index
    %34 = vector.load %arg8[%c0_18, %c0_19] : memref<8x128xf32, #tpu.memory_space<vmem>>, vector<8x128xf32>
    tpu.vector_store %arg8[%c0_18, %c0_19], %14 {strides = array<i32>} : memref<8x128xf32, #tpu.memory_space<vmem>>, vector<8x128xf32>,
    %c0_20 = arith.constant 0 : index
    %c0_21 = arith.constant 0 : index
    %35 = vector.load %arg7[%c0_20, %c0_21] : memref<8x128xf32, #tpu.memory_space<vmem>>, vector<8x128xf32>
    tpu.vector_store %arg7[%c0_20, %c0_21], %14 {strides = array<i32>} : memref<8x128xf32, #tpu.memory_space<vmem>>, vector<8x128xf32>,
    return
  }
  func.func @transform_0(%arg0: i32) -> (i32, i32, i32) {
    %c0_i32 = arith.constant 0 : i32
    %c0_i32_0 = arith.constant 0 : i32
    %c0_i32_1 = arith.constant 0 : i32
    return %arg0, %c0_i32, %c0_i32_0 : i32, i32, i32
  }
  func.func @transform_1(%arg0: i32) -> (i32, i32) {
    %c0_i32 = arith.constant 0 : i32
    %c0_i32_0 = arith.constant 0 : i32
    %c0_i32_1 = arith.constant 0 : i32
    return %c0_i32, %c0_i32_0 : i32, i32
  }
  func.func @transform_2(%arg0: i32) -> (i32, i32) {
    %c0_i32 = arith.constant 0 : i32
    %c0_i32_0 = arith.constant 0 : i32
    %c0_i32_1 = arith.constant 0 : i32
    return %c0_i32, %c0_i32_0 : i32, i32
  }
  func.func @transform_3(%arg0: i32) -> (i32, i32) {
    %c0_i32 = arith.constant 0 : i32
    %c0_i32_0 = arith.constant 0 : i32
    %c0_i32_1 = arith.constant 0 : i32
    return %c0_i32, %c0_i32_0 : i32, i32
  }
  func.func @transform_4(%arg0: i32) -> (i32, i32) {
    %c0_i32 = arith.constant 0 : i32
    %c0_i32_0 = arith.constant 0 : i32
    %c0_i32_1 = arith.constant 0 : i32
    return %c0_i32, %c0_i32_0 : i32, i32
  }
  func.func @transform_5(%arg0: i32) -> (i32, i32, i32) {
    %c0_i32 = arith.constant 0 : i32
    %c0_i32_0 = arith.constant 0 : i32
    %c0_i32_1 = arith.constant 0 : i32
    return %arg0, %c0_i32, %c0_i32_0 : i32, i32, i32
  }
  func.func @transform_6(%arg0: i32) -> (i32, i32) {
    %c0_i32 = arith.constant 0 : i32
    %c0_i32_0 = arith.constant 0 : i32
    %c0_i32_1 = arith.constant 0 : i32
    return %c0_i32, %c0_i32_0 : i32, i32
  }
}

</mosaic_0001>

<bundles_post_ra>
// kernel: tpu_custom_call.1
= control target key start
LH: loop header
LB: loop body
LE: loop exit
PB: predicated region body
PF: predicated region fallthrough
CT: control target
= control target key end

     0   :  { %12 = vsyncpa [#allocation4], 0  ;;  %s1359_s0 = inlined_call_operand.hbm [shape: f32[8,8,16], index: 0, kind: input, shape index: {}]   ;;  %s1360_s1 = inlined_call_operand.hbm [shape: f32[8,128], index: 1, kind: input, shape index: {}]   ;;  %s1361_s2 = inlined_call_operand.hbm [shape: f32[16,256], index: 2, kind: input, shape index: {}]   ;;  %s1362_s3 = inlined_call_operand.hbm [shape: f32[128,256], index: 3, kind: input, shape index: {}]   ;;  %s1363_s4 = inlined_call_operand.vmem [shape: f32[1,256], index: 4, kind: input, shape index: {}]   ;;  %s1364_s5 = inlined_call_operand.hbm [shape: f32[8,8,128], index: 5, kind: output, shape index: {0}]   ;;  %s1365_s6 = inlined_call_operand.hbm [shape: f32[8,128], index: 6, kind: output, shape index: {1}]  }
   0x1   :  { %14 = vsyncpa [#allocation4 + $0x1], 0 }
   0x2   :  { %15 = vsyncpa [#allocation7], 0 }
   0x3   :  { %16 = vsyncpa [#allocation10], 0 }
   0x4   :  { %17 = vsyncpa [#allocation5], 0 }
   0x5   :  { %19 = vsyncpa [#allocation5 + $0x1], 0 }
   0x6   :  { %20 = vsyncpa [#allocation13], 0  ;;  %s1079_s21 = smov 0   ;;  %s1081_s22 = smov 0  }
   0x7   :  { %s1083_s23 = smov 0   ;;  %s1085_s24 = smov 0  }
   0x8 LB: > { %s1100_s25 = sadd.s32 4294967295, %s1033_s24   ;;  %s664_s26 = sadd.s32 4294967294, %s1033_s24   ;;  %s1033_s24 = sphi %s1085_s24, %s1393_s24   ;;  %s1029_s23 = sphi %s1083_s23, %s1392_s23   ;;  %s1025_s22 = sphi %s1081_s22, %s1391_s22   ;;  %s1021_s21 = sphi %s1079_s21, %s1390_s21  }
   0x9   : > { %p46_p0 = scmp.ne.s32.totalorder %s1025_s22, %s1021_s21  ;;  %p1366_p1 = scmp.eq.s32.totalorder %s1100_s25, 0 }
   0xa   : > { %p160_p3 = scmp.eq.s32.totalorder %s664_s26, 7  ;;  %p665_p5 = scmp.ge.s32.totalorder %s1033_s24, 1 }
   0xb   : > { %p1109_p4 = por %p1366_p1, %p46_p0  ;;  %p188_p7 = scmp.lt.s32.totalorder %s1033_s24, 9 }
   0xc   : > { %p1114_p6 = por %p160_p3, %p46_p0  ;;  %s1035_s30 = smov [#allocation6]  }
   0xd   : > { %s1369_s27 = scalar_select %p1109_p4, 1, 0 }
   0xe   : > { %s1370_s28 = scalar_select %p1114_p6, 1, 0 }
   0xf   : > { %p1120_p9 = pnand %p665_p5, %p188_p7  ;;  %s201_s7 = sshll.u32 %s1035_s30, 4  ;;  %s202_s7 = int_to_ptr.vmem [resolvable:$true] %s201_s7 }
  0x10   : > { %s1036_s8 = smov [#allocation8]   ;;  %s1037_s11 = smov [#allocation9]  }
  0x11   : > { %s1371_s29 = scalar_select %p1120_p9, 1, 0 }
  0x12   : > { %p744_p10 = pneg %p1120_p9  ;;  %s211_s9 = sshll.u32 %s1036_s8, 4  ;;  %s1132_s9 = int_to_ptr.vmem [resolvable:$true] %s211_s9 }
  0x13   : > { %s1134_s12 = sshll.u32 %s1037_s11, 4  ;;  %s815_s15 = scalar_lea.hbm %s1360_s1, 128  ;;  %s225_s12 = int_to_ptr.vmem [resolvable:$true] %s1134_s12 }
  0x14   : > { %p1128_p11 = pnand %p744_p10, %p1366_p1  ;;  %p816_p12 = scmp.ne.s32.totalorder %s1360_s1, %s815_s15 }
  0x15   : > { %p822_p5 = scmp.lt.u32.totalorder %s815_s15, %s1360_s1 }
  0x16   : > { %p1144_p13 = pneg %p1128_p11 }
  0x18   : > { %p818_p0 = pnand %p1144_p13, %p816_p12 }
  0x1a   : > { %p819_p3 = pneg %p818_p0 }
  0x1c   : > { %p824_p7 = pnand %p822_p5, %p819_p3 }
  0x1e   : > { %827 = shalt.err (!%p824_p7)
}
  0x1f   : > { %s828_s26 = scalar_lea.vmem %s202_s7, 128  ;;  %p836_p2 = scmp.lt.s32.totalorder %s202_s7, %s202_s7 }
  0x20   : > { %p829_p10 = scmp.ne.s32.totalorder %s202_s7, %s828_s26  ;;  %p837_p6 = scmp.lt.s32.totalorder %s828_s26, %s828_s26 }
  0x22   : > { %p831_p8 = pnand %p829_p10, %p1144_p13  ;;  %p838_p4 = por %p837_p6, %p836_p2 }
  0x24   : > { %p832_p1 = pneg %p831_p8 }
  0x26   : > { %p839_p9 = pnand %p838_p4, %p832_p1 }
  0x28   : > { %842 = shalt.err (!%p839_p9)
}
  0x29   : > { %747 = dma.hbm_to_vmem [thread:$0]  (!%p1128_p11), %s1360_s1, 128, %s202_s7, [#allocation7]  }
  0x2a   : > { %s843_s14 = scalar_lea.hbm %s1361_s2, 512 }
  0x2b   : > { %p844_p8 = scmp.ne.s32.totalorder %s1361_s2, %s843_s14  ;;  %p850_p1 = scmp.lt.u32.totalorder %s843_s14, %s1361_s2 }
  0x2d   : > { %p846_p12 = pnand %p844_p8, %p1144_p13 }
  0x2f   : > { %p847_p2 = pneg %p846_p12 }
  0x31   : > { %p852_p4 = pnand %p850_p1, %p847_p2 }
  0x33   : > { %855 = shalt.err (!%p852_p4)
}
  0x34   : > { %s856_s7 = scalar_lea.vmem %s1132_s9, 512  ;;  %p864_p3 = scmp.lt.s32.totalorder %s1132_s9, %s1132_s9 }
  0x35   : > { %p857_p6 = scmp.ne.s32.totalorder %s1132_s9, %s856_s7  ;;  %p865_p5 = scmp.lt.s32.totalorder %s856_s7, %s856_s7 }
  0x37   : > { %p859_p9 = pnand %p857_p6, %p1144_p13  ;;  %p866_p7 = por %p865_p5, %p864_p3 }
  0x39   : > { %p860_p0 = pneg %p859_p9 }
  0x3b   : > { %p867_p10 = pnand %p866_p7, %p860_p0 }
  0x3d   : > { %870 = shalt.err (!%p867_p10)
}
  0x3e   : > { %s1038_s20 = smov 256   ;;  %s1039_s26 = smov 16  }
  0x3f   : > { %750 = dma.hbm_to_vmem [thread:$0]  (!%p1128_p11), %s1361_s2, 512, %s1132_s9, [#allocation7], %s1038_s20, %s1038_s20, %s1039_s26  }
  0x40   : > { %s871_s14 = scalar_lea.hbm %s1362_s3, 4096 }
  0x41   : > { %p872_p8 = scmp.ne.s32.totalorder %s1362_s3, %s871_s14  ;;  %p878_p1 = scmp.lt.u32.totalorder %s871_s14, %s1362_s3 }
  0x43   : > { %p874_p12 = pnand %p872_p8, %p1144_p13 }
  0x45   : > { %p875_p2 = pneg %p874_p12 }
  0x47   : > { %p880_p4 = pnand %p878_p1, %p875_p2 }
  0x49   : > { %883 = shalt.err (!%p880_p4)
}
  0x4a   : > { %s884_s7 = scalar_lea.vmem %s225_s12, 4096  ;;  %p892_p3 = scmp.lt.s32.totalorder %s225_s12, %s225_s12 }
  0x4b   : > { %p885_p6 = scmp.ne.s32.totalorder %s225_s12, %s884_s7  ;;  %p893_p5 = scmp.lt.s32.totalorder %s884_s7, %s884_s7 }
  0x4d   : > { %p887_p9 = pnand %p885_p6, %p1144_p13  ;;  %p894_p7 = por %p893_p5, %p892_p3 }
  0x4f   : > { %p888_p0 = pneg %p887_p9 }
  0x51   : > { %p895_p10 = pnand %p894_p7, %p888_p0 }
  0x53   : > { %898 = shalt.err (!%p895_p10)
}
  0x54   : > { %753 = dma.hbm_to_vmem [thread:$0]  (!%p1128_p11), %s1362_s3, 4096, %s225_s12, [#allocation10], %s1038_s20, %s1038_s20, %s1039_s26  }
  0x55   : > { %s1203_s18 = sadd.s32 1, %s1033_s24   ;;  %s33_s10 = sadd.s32 1, %s1029_s23 }
  0x56   : > { %s30_s8 = ssub.s32 %s1033_s24, %s1203_s18  ;;  %p40_p8 = scmp.ne.s32.totalorder %s1029_s23, %s1025_s22 }
  0x57   : > { %p31_p13 = scmp.eq.s32.totalorder %s30_s8, 0  ;;  %p41_p12 = scmp.eq.s32.totalorder %s1033_s24, 0 }
  0x58   : > { %p765_p2 = scmp.lt.s32.totalorder %s1033_s24, 8  ;;  %p1374_p4 = scmp.eq.s32.totalorder %s1100_s25, 7 }
  0x59   : > { %s1213_s11 = scalar_select %p31_p13, %s1029_s23, %s33_s10  }
  0x5a   : > { %p42_p1 = por %p41_p12, %p40_p8  ;;  %p1217_p6 = por %p1374_p4, %p40_p8 }
  0x5b   : > { %s241_s14 = sand.u32 1, %s1029_s23   ;;  %s671_s15 = sshll.u32 %s1033_s24, 7 }
  0x5c   : > { %s670_s12 = sshll.u32 %s241_s14, 3  ;;  %s1226_s16 = scalar_lea.hbm %s1359_s0, %s671_s15 }
  0x5d   : > { %s245_s17 = scalar_lea.vmem [#allocation3], %s670_s12  ;;  %p1228_p11 = pnand %p765_p2, %p42_p1 }
  0x5e   : > { %s252_s19 = sshll.u32 %s245_s17, 4  ;;  %s242_s9 = scalar_lea.sflag [#allocation4], %s241_s14  ;;  %s1232_s19 = int_to_ptr.vmem [resolvable:$true] %s252_s19 }
  0x5f   : > { %s899_s30 = scalar_lea.hbm %s1226_s16, 128  ;;  %p901_p0 = pneg %p1228_p11 }
  0x60   : > { %p900_p9 = scmp.ne.s32.totalorder %s1226_s16, %s899_s30  ;;  %s904_s15 = scalar_lea.hbm %s1359_s0, 1024 }
  0x61   : > { %p905_p7 = scmp.lt.u32.totalorder %s1226_s16, %s1359_s0  ;;  %p906_p10 = scmp.lt.u32.totalorder %s904_s15, %s899_s30 }
  0x62   : > { %p902_p3 = pnand %p901_p0, %p900_p9  ;;  %p908_p8 = scmp.lt.u32.totalorder %s899_s30, %s1226_s16 }
  0x63   : > { %p907_p13 = por %p906_p10, %p905_p7 }
  0x64   : > { %p903_p5 = pneg %p902_p3 }
  0x65   : > { %p909_p12 = por %p908_p8, %p907_p13 }
  0x67   : > { %p910_p2 = pnand %p909_p12, %p903_p5 }
  0x69   : > { %913 = shalt.err (!%p910_p2)
}
  0x6a   : > { %s914_s14 = scalar_lea.vmem %s1232_s19, 128  ;;  %s1040_s26 = smov [#allocation3]  }
  0x6b   : > { %p915_p1 = scmp.ne.s32.totalorder %s1232_s19, %s914_s14  ;;  %s919_s17 = sshll.u32 %s1040_s26, 4  ;;  %s920_s17 = int_to_ptr.vmem [resolvable:$false] %s919_s17 }
  0x6c   : > { %s921_s8 = scalar_lea.vmem %s920_s17, 256  ;;  %p922_p3 = scmp.lt.s32.totalorder %s1232_s19, %s920_s17 }
  0x6d   : > { %p917_p4 = pnand %p915_p1, %p901_p0  ;;  %p923_p7 = scmp.lt.s32.totalorder %s921_s8, %s914_s14 }
  0x6f   : > { %p918_p9 = pneg %p917_p4  ;;  %p924_p10 = por %p923_p7, %p922_p3 }
  0x71   : > { %p925_p13 = pnand %p924_p10, %p918_p9 }
  0x73   : > { %928 = shalt.err (!%p925_p13)
}
  0x74   : > { %757 = dma.hbm_to_vmem [thread:$0]  (!%p1228_p11), %s1226_s16, 128, %s1232_s19, %s242_s9  }
  0x75   : > { %p1377_p5 = scmp.ne.s32.totalorder %s1371_s29, 0 }
  0x76   : > { %s1262_s30 = sand.u32 (!%p1377_p5), 1, %s1025_s22   ;;  %p1378_p0 = scmp.ne.s32.totalorder (!%p1377_p5), %s1369_s27, 0 }
  0x77   : > { %261 = sbr.rel (%p1377_p5) target bundleno = 729 (0x2d9), region = 40  ;;  %s673_s10 = sshll.u32 (!%p1377_p5), %s1262_s30, 3 }
  0x78   : > { %s264_s15 = scalar_lea.sflag (!%p1377_p5), [#allocation4], %s1262_s30  ;;  %s1266_s12 = scalar_lea.vmem (!%p1377_p5), [#allocation3], %s673_s10 }
  0x7e   : > { %1000 = dma.done.wait (%p1378_p0), %s264_s15, 128  }
  0x7f   : > { %1002 = vsyncadd (%p1378_p0), %s264_s15, 4294967168  ;;  %p1379_p11 = scmp.eq.s32.totalorder %s1100_s25, 0 }
  0x81   : > { %1004 = dma.done.wait (%p1379_p11), [#allocation7], 640   ;;  %p1380_p8 = pmov %p1379_p11 }
  0x83   : > { %1006 = vsyncadd (%p1380_p8), [#allocation7], 4294966656  ;;  %p1381_p12 = pmov %p1380_p8 }
  0x84   : > { %p1382_p2 = pmov %p1380_p8 }
  0x85   : > { %1008 = dma.done.wait (%p1381_p12), [#allocation10], 4096  }
  0x86   : > { %1010 = vsyncadd (%p1382_p2), [#allocation10], 4294963200  ;;  %s1280_s29 = scalar_lea.vmem [#allocation11], %s673_s10  ;;  %p1383_p1 = scmp.ne.s32.totalorder %s1100_s25, 0 }
  0x87   : > { %v312_v0 = vld [vmem:[#allocation6] sm:$0xff] (!%p1383_p1) }
  0x88   : > { %311 = sbr.rel (%p1383_p1) target bundleno = 143 (0x8f), region = 60  ;;  %313 = vst [vmem:[#allocation2] sm:$0xff] (!%p1383_p1), %v312_v0 }
  0x8f PF: > { %v321_v1 = vld [vmem:[#allocation9 + $0x8] sm:$0xff]  ;;  %v323_v2 = vld [vmem:[#allocation9 + $0x18] sm:$0xff]  ;;  %v320_v3 = vld [vmem:[#allocation9] sm:$0xff]  ;;  %v1041_v8 = vmov 0.0   ;;  %vm423_vm0 = vcmask 130048   ;;  %v500_v60 = vlaneseq  ;;  %s1042_s19 = smov [#allocation12]  }
  0x90   : > { %v686_v4 = vpack.c.bf16 %v323_v2, %v321_v1  ;;  %v322_v5 = vld [vmem:[#allocation9 + $0x10] sm:$0xff]  ;;  %v325_v6 = vld [vmem:[#allocation9 + $0x28] sm:$0xff]  ;;  %v327_v7 = vld [vmem:[#allocation9 + $0x38] sm:$0xff]  ;;  %491 = vmatprep.mubr.f32.mxu0 %v1041_v8  ;;  %416 = vmatprep.mubr.f32.mxu1 %v1041_v8  ;;  %s554_s7 = sshll.u32 %s1042_s19, 4  ;;  %p1384_p9 = scmp.eq.s32.totalorder %s1100_s25, 7  ;;  %s555_s7 = int_to_ptr.vmem [resolvable:$true] %s554_s7 }
  0x91   : > { %v688_v9 = vpack.c.bf16 %v322_v5, %v320_v3  ;;  %v690_v10 = vpack.c.bf16 %v327_v7, %v325_v6  ;;  %v324_v11 = vld [vmem:[#allocation9 + $0x20] sm:$0xff]  ;;  %v326_v12 = vld [vmem:[#allocation9 + $0x30] sm:$0xff]  ;;  %v329_v13 = vld [vmem:[#allocation9 + $0x48] sm:$0xff]  ;;  %v501_v61 = vshrl.u32 %v500_v60, 7  ;;  %v513_v1 = vand.u32 127, %v500_v60  ;;  %s929_s9 = scalar_lea.vmem %s555_s7, 128  ;;  %p936_p10 = scmp.lt.s32.totalorder %s555_s7, %s555_s7 }
  0x92   : > { %687 = vmatprep.subr.bf16.mxu1 %v686_v4  ;;  %v331_v14 = vld [vmem:[#allocation9 + $0x58] sm:$0xff]  ;;  %v692_v15 = vpack.c.bf16 %v326_v12, %v324_v11  ;;  %v328_v17 = vld [vmem:[#allocation9 + $0x40] sm:$0xff]  ;;  %v330_v18 = vld [vmem:[#allocation9 + $0x50] sm:$0xff]  ;;  %p930_p4 = scmp.ne.s32.totalorder %s555_s7, %s929_s9  ;;  %p937_p13 = scmp.lt.s32.totalorder %s929_s9, %s929_s9 }
  0x93   : > { %689 = vmatpush1.bf16.msra.mxu1 %v688_v9  ;;  %v694_v16 = vpack.c.bf16 %v331_v14, %v329_v13  ;;  %v333_v19 = vld [vmem:[#allocation9 + $0x68] sm:$0xff]  ;;  %v335_v20 = vld [vmem:[#allocation9 + $0x78] sm:$0xff]  ;;  %v696_v21 = vpack.c.bf16 %v330_v18, %v328_v17  ;;  %v332_v22 = vld [vmem:[#allocation9 + $0x60] sm:$0xff]  ;;  %v502_v62 = vsub.s32 0, %v501_v61  ;;  %v506_v0 = vsub.s32 1, %v501_v61 }
  0x94   : > { %691 = vmatprep.subr.bf16.mxu1 %v690_v10  ;;  %v698_v23 = vpack.c.bf16 %v335_v20, %v333_v19  ;;  %v334_v24 = vld [vmem:[#allocation9 + $0x70] sm:$0xff]  ;;  %v317_v25 = vld [vmem:[#allocation8 + $0x8] sm:$0xff]  ;;  %v319_v26 = vld [vmem:[#allocation8 + $0x18] sm:$0xff]  ;;  %vm514_vm1 = vcmp.lt.s32.totalorder %v513_v1, 16  ;;  %p931_p3 = pnand %p930_p4, %p1384_p9  ;;  %p938_p5 = por %p937_p13, %p936_p10 }
  0x95   : > { %v337_v27 = vld [vmem:[#allocation9 + $0x88] sm:$0xff]  ;;  %v339_v28 = vld [vmem:[#allocation9 + $0x98] sm:$0xff]  ;;  %v718_v29 = vpack.c.bf16 %v319_v26, %v317_v25  ;;  %v316_v30 = vld [vmem:[#allocation8] sm:$0xff]  ;;  %v700_v32 = vpack.c.bf16 %v334_v24, %v332_v22 }
  0x96   : > { %v318_v31 = vld [vmem:[#allocation8 + $0x10] sm:$0xff]  ;;  %v702_v34 = vpack.c.bf16 %v339_v28, %v337_v27  ;;  %v336_v35 = vld [vmem:[#allocation9 + $0x80] sm:$0xff]  ;;  %v341_v37 = vld [vmem:[#allocation9 + $0xa8] sm:$0xff]  ;;  %p932_p7 = pneg %p931_p3 }
  0x97   : > { %693 = vmatpush1.bf16.msra.mxu1 %v692_v15  ;;  %719 = vmatprep.subr.bf16.mxu0 %v718_v29  ;;  %v720_v33 = vpack.c.bf16 %v318_v31, %v316_v30  ;;  %v338_v36 = vld [vmem:[#allocation9 + $0x90] sm:$0xff]  ;;  %v343_v38 = vld [vmem:[#allocation9 + $0xb8] sm:$0xff]  ;;  %v340_v42 = vld [vmem:[#allocation9 + $0xa0] sm:$0xff] }
  0x98   : > { %695 = vmatprep.subr.bf16.mxu1 %v694_v16  ;;  %v314_v39 = vld [vmem:[%s1266_s12] sm:$0xff]  ;;  %v704_v40 = vpack.c.bf16 %v338_v36, %v336_v35  ;;  %v706_v41 = vpack.c.bf16 %v343_v38, %v341_v37  ;;  %v347_v45 = vld [vmem:[#allocation9 + $0xd8] sm:$0xff]  ;;  %v344_v48 = vld [vmem:[#allocation9 + $0xc0] sm:$0xff]  ;;  %p939_p0 = pnand %p938_p5, %p932_p7 }
  0x99   : > { %721 = vmatpush1.bf16.msra.mxu0 %v720_v33  ;;  %v342_v43 = vld [vmem:[#allocation9 + $0xb0] sm:$0xff]  ;;  %v345_v44 = vld [vmem:[#allocation9 + $0xc8] sm:$0xff]  ;;  %v351_v51 = vld [vmem:[#allocation9 + $0xf8] sm:$0xff] }
  0x9a   : > { %v708_v46 = vpack.c.bf16 %v342_v43, %v340_v42  ;;  %v710_v47 = vpack.c.bf16 %v347_v45, %v345_v44  ;;  %v346_v49 = vld [vmem:[#allocation9 + $0xd0] sm:$0xff]  ;;  %v349_v50 = vld [vmem:[#allocation9 + $0xe8] sm:$0xff]  ;;  %v348_v54 = vld [vmem:[#allocation9 + $0xe0] sm:$0xff] }
  0x9b   : > { %697 = vmatpush1.bf16.msra.mxu1 %v696_v21  ;;  %v712_v52 = vpack.c.bf16 %v346_v49, %v344_v48  ;;  %v714_v53 = vpack.c.bf16 %v351_v51, %v349_v50  ;;  %v350_v55 = vld [vmem:[#allocation9 + $0xf0] sm:$0xff]  ;;  %v315_v57 = vld [vmem:[#allocation2] sm:$0xff] }
  0x9c   : > { %699 = vmatprep.subr.bf16.mxu1 %v698_v23  ;;  %679 = vmatmul.mubr.msk.f32.vlgmr.msra.gmra.mrb[0].mxu0 %vm423_vm0, %v314_v39  ;;  %v716_v56 = vpack.c.bf16 %v350_v55, %v348_v54  ;;  %v498_v63 = vld [vmem:[%s1363_s4] sm:$0x3] }
  0x9d   : > { %v503_v2 = vrot.slane %v498_v63, %v502_v62  ;;  %v507_v4 = vrot.slane %v498_v63, %v506_v0 }
  0x9f   : > { %701 = vmatpush1.bf16.msra.mxu1 %v700_v32 }
  0xa0   : > { %703 = vmatprep.subr.bf16.mxu1 %v702_v34 }
  0xa3   : > { %705 = vmatpush1.bf16.msra.mxu1 %v704_v40 }
  0xa4   : > { %707 = vmatprep.subr.bf16.mxu1 %v706_v41 }
  0xa7   : > { %709 = vmatpush1.bf16.msra.mxu1 %v708_v46 }
  0xa8   : > { %711 = vmatprep.subr.bf16.mxu1 %v710_v47 }
  0xab   : > { %713 = vmatpush1.bf16.msra.mxu1 %v712_v52 }
  0xac   : > { %715 = vmatprep.subr.bf16.mxu1 %v714_v53 }
  0xaf   : > { %717 = vmatpush1.bf16.msra.mxu1 %v716_v56 }
  0xb2   : > { %417 = vmatmul.mubr.f32.vlgmr.msra.gmra.mrb[0].mxu1 %v315_v57 }
 0x16f   : > { %v493_v58 = vpop.f32.mrb[0].mxu0 }
 0x170   : > { %v495_v59 = vpop.f32.mrb[1].mxu0 }
 0x185   : > { %v418_v3 = vpop.f32.mrb[0].mxu1 }
 0x186   : > { %v494_v5 = vadd.f32 %v493_v58, %v418_v3  ;;  %v420_v6 = vpop.f32.mrb[1].mxu1 }
 0x187   : > { %v496_v7 = vadd.f32 %v495_v59, %v420_v6 }
 0x188   : > { %v510_v8 = vadd.f32 %v503_v2, %v494_v5 }
 0x189   : > { %v511_v9 = vadd.f32 %v507_v4, %v496_v7 }
 0x18a   : > { %527 = vst [vmem:[#allocation2] sm:$0xff] %v510_v8  ;;  %528 = vst [vmem:[#allocation12] sm:$0xff] %v510_v8 }
 0x18b   : > { %v515_v10 = vsel %vm514_vm1, %v511_v9, -inf }
 0x18c   : > { %516 = vmax.xlane.f32.xlu0 %v515_v10 }
 0x219   : > { %v517_v11 = vpop.xlane.xlu0 %516 }
 0x21a   : > { %v518_v12 = vsub.f32 %v515_v10, %v517_v11 }
 0x21c   : > { %v519_v13 = vmul.f32 1.442695, %v518_v12 }
 0x21e   : > { %811 = vpow2.f32 %v519_v13 }
 0x228   : > { %v812_v14 = vpop.eup %811 }
 0x229   : > { %521 = vadd.xlane.f32.xlu0 %v812_v14 }
 0x22a   : > { %942 = shalt.err (!%p939_p0)
}
 0x22b   : > { %s943_s26 = scalar_lea.hbm %s1365_s6, 128  ;;  %p1385_p8 = pmov %p1384_p9 }
 0x22c   : > { %p944_p11 = scmp.ne.s32.totalorder %s1365_s6, %s943_s26  ;;  %p949_p1 = scmp.lt.u32.totalorder %s943_s26, %s1365_s6 }
 0x22e   : > { %p945_p12 = pnand %p944_p11, %p1385_p8 }
 0x230   : > { %p946_p2 = pneg %p945_p12 }
 0x232   : > { %p951_p4 = pnand %p949_p1, %p946_p2 }
 0x234   : > { %954 = shalt.err (!%p951_p4)
}
 0x235   : > { %p1386_p9 = pmov %p1385_p8  ;;  %s681_s16 = sshll.u32 %s1100_s25, 7 }
 0x236   : > { %s543_s19 = sshll.u32 %s1280_s29, 4  ;;  %s1311_s14 = scalar_lea.hbm %s1364_s5, %s681_s16  ;;  %s1313_s19 = int_to_ptr.vmem [resolvable:$true] %s543_s19 }
 0x237   : > { %740 = dma.vmem_to_hbm [thread:$0]  (%p1386_p9), %s555_s7, 128, %s1365_s6, [#allocation13]  }
 0x238   : > { %s530_s26 = scalar_lea.sflag [#allocation5], %s1262_s30  ;;  %s955_s7 = scalar_lea.vmem %s1313_s19, 128 }
 0x239   : > { %p956_p3 = scmp.ne.s32.totalorder %s1313_s19, %s955_s7  ;;  %s1043_s17 = smov [#allocation11]  }
 0x23a   : > { %s959_s8 = sshll.u32 %s1043_s17, 4  ;;  %s960_s8 = int_to_ptr.vmem [resolvable:$false] %s959_s8 }
 0x23b   : > { %p957_p7 = pnand %p956_p3, %p1217_p6  ;;  %s961_s10 = scalar_lea.vmem %s960_s8, 256 }
 0x23c   : > { %p962_p13 = scmp.lt.s32.totalorder %s1313_s19, %s960_s8  ;;  %p963_p5 = scmp.lt.s32.totalorder %s961_s10, %s955_s7 }
 0x23d   : > { %p958_p10 = pneg %p957_p7 }
 0x23e   : > { %p964_p0 = por %p963_p5, %p962_p13 }
 0x240   : > { %p965_p11 = pnand %p964_p0, %p958_p10 }
 0x2b6   : > { %v522_v15 = vpop.xlane.xlu0 %521 }
 0x2b7   : > { %813 = vlog2.f32 %v522_v15 }
 0x2c1   : > { %v814_v16 = vpop.eup %813 }
 0x2c2   : > { %v524_v17 = vmul.f32 0.6931472, %v814_v16 }
 0x2c4   : > { %v525_v18 = vsub.f32 %v518_v12, %v524_v17 }
 0x2c6   : > { %526 = vst [vmem:[%s1280_s29] sm:$0xff] %v525_v18 }
 0x2c7   : > { %968 = shalt.err (!%p965_p11)
}
 0x2c8   : > { %s969_s30 = scalar_lea.hbm %s1311_s14, 128  ;;  %s973_s12 = scalar_lea.hbm %s1364_s5, 1024 }
 0x2c9   : > { %p970_p8 = scmp.ne.s32.totalorder %s1311_s14, %s969_s30  ;;  %p974_p1 = scmp.lt.u32.totalorder %s1311_s14, %s1364_s5 }
 0x2ca   : > { %p975_p4 = scmp.lt.u32.totalorder %s973_s12, %s969_s30  ;;  %p977_p3 = scmp.lt.u32.totalorder %s969_s30, %s1311_s14 }
 0x2cb   : > { %p971_p12 = pnand %p970_p8, %p1217_p6 }
 0x2cc   : > { %p976_p9 = por %p975_p4, %p974_p1 }
 0x2cd   : > { %p972_p2 = pneg %p971_p12 }
 0x2ce   : > { %p978_p7 = por %p977_p3, %p976_p9 }
 0x2d0   : > { %p979_p10 = pnand %p978_p7, %p972_p2 }
 0x2d2   : > { %982 = shalt.err (!%p979_p10)
}
 0x2d3   : > { %738 = dma.vmem_to_hbm [thread:$0]  (%p1217_p6), %s1313_s19, 128, %s1311_s14, %s530_s26  }
 0x2d4   : > { %p1387_p13 = scmp.eq.s32.totalorder %s1100_s25, 7 }
 0x2d6   : > { %1012 = dma.done.wait (%p1387_p13), [#allocation13], 128   ;;  %p1388_p5 = pmov %p1387_p13 }
 0x2d8   : > { %1014 = vsyncadd (%p1388_p5), [#allocation13], 4294967168 }
 0x2d9 PF: > { %p771_p0 = scmp.ge.s32.totalorder %s1033_s24, 2  ;;  %s570_s9 = sand.u32 1, %s1021_s21  }
 0x2da   : > { %p1389_p11 = scmp.ne.s32.totalorder %s1370_s28, 0  ;;  %s571_s20 = scalar_lea.sflag [#allocation5], %s570_s9 }
 0x2dc   : > { %p759_p8 = pnand %p771_p0, %p1389_p11 }
 0x2de   : > { %1016 = dma.done.wait (!%p759_p8), %s571_s20, 128  }
 0x2df   : > { %1018 = vsyncadd (!%p759_p8), %s571_s20, 4294967168  ;;  %p23_p6 = scmp.ge.s32.totalorder %s1203_s18, 10   ;;  %s1390_s21 = smov %s1025_s22 }
 0x2e0   : > { %s1391_s22 = smov %s1029_s23  ;;  %s1392_s23 = smov %s1213_s11 }
 0x2e1   : > { %s1393_s24 = smov %s1203_s18  ;;  %25 = sbr.rel (!%p23_p6) target bundleno = 8 (0x8), region = 109 }
 0x2e8   :  { %576 = vsyncpa [#allocation4], 1 }
 0x2e9   :  { %578 = vsyncpa [#allocation4 + $0x1], 1 }
 0x2ea   :  { %579 = vsyncpa [#allocation7], 1 }
 0x2eb   :  { %580 = vsyncpa [#allocation10], 1 }
 0x2ec   :  { %581 = vsyncpa [#allocation5], 1 }
 0x2ed   :  { %583 = vsyncpa [#allocation5 + $0x1], 1 }
 0x2ee   :  { %584 = vsyncpa [#allocation13], 1 }

</bundles_post_ra>
